<compile_context>
chip_gen: v7x
topology: tpu7x:2x2x1
jax: 0.10.0
libtpu: 0.0.40
codegen_flags: <defaults>
</compile_context>

<pallas_src>
import functools

import jax
import jax.numpy as jnp
from jax.experimental import pallas as pl
from jax.experimental.pallas import tpu as pltpu


# ---------------------------------------------------------------------------
# Pallas kernel
# ---------------------------------------------------------------------------
def _residual_block_kernel(x_ref, w1_ref, g1_ref, be1_ref,
                           w2_ref, g2_ref, be2_ref, out_ref, *, W):
    """Fused ResidualBlock for a block of Nb samples.

    Activations live as (Nb, C, H*W) with H*W on the lane axis.  Each 3x3
    conv with reflection padding is computed as a single batched matmul
    against an im2col tensor assembled from lane rotations + boundary masks.
    """
    Nb, C, HW = out_ref.shape
    x = x_ref[...].astype(jnp.float32)

    # Lane-position masks for the reflection boundaries (shared by both convs).
    p = jax.lax.broadcasted_iota(jnp.int32, (Nb, C, HW), 2)
    col = p % W
    m_x_first = col == 0            # x == 0
    m_x_last = col == (W - 1)       # x == W-1
    m_y_first = p < W               # y == 0
    m_y_last = p >= (HW - W)        # y == H-1

    def rot(a, k):
        # Unambiguous lane rotation: out[..., i] = a[..., (i + k) % HW].
        k = k % HW
        if k == 0:
            return a
        return jnp.concatenate([a[..., k:], a[..., :k]], axis=-1)

    def conv3x3(a, w_ref):
        # Row (dy) shifts with reflection at the top/bottom edges.
        r_dn = rot(a, W)                               # reads (y+1, x)
        r_up = rot(a, -W)                              # reads (y-1, x)
        h_m1 = jnp.where(m_y_first, r_dn, r_up)        # dy = -1  (row 0 <- row 1)
        h_p1 = jnp.where(m_y_last, r_up, r_dn)         # dy = +1  (row H-1 <- row H-2)

        taps = []
        for h in (h_m1, a, h_p1):                      # dy = -1, 0, +1
            c_rt = rot(h, 1)                           # reads (y, x+1)
            c_lt = rot(h, -1)                          # reads (y, x-1)
            taps.append(jnp.where(m_x_first, c_rt, c_lt))  # dx = -1
            taps.append(h)                                  # dx =  0
            taps.append(jnp.where(m_x_last, c_lt, c_rt))    # dx = +1

        # im2col: (Nb, 9C, HW), tap index k = ky*3 + kx, row index = k*C + ci.
        s = jnp.concatenate(taps, axis=1)
        w = jnp.broadcast_to(w_ref[...].astype(jnp.float32), (Nb, C, 9 * C))
        # One batched matmul per conv: (Nb, C, 9C) x (Nb, 9C, HW) -> (Nb, C, HW)
        return jax.lax.dot_general(
            w, s,
            dimension_numbers=(((2,), (1,)), ((0,), (0,))),
            preferred_element_type=jnp.float32)

    def instance_norm(a, g_ref, b_ref):
        # Biased variance over H*W per (sample, channel); fused affine.
        mean = jnp.mean(a, axis=2, keepdims=True)
        var = jnp.mean((a - mean) ** 2, axis=2, keepdims=True)
        scale = g_ref[...] * jax.lax.rsqrt(var + 1e-5)      # (Nb, C, 1)
        shift = b_ref[...] - mean * scale
        return a * scale + shift

    # conv1 -> IN1 -> ReLU       (conv bias cancelled by the IN mean subtraction)
    t = jnp.maximum(instance_norm(conv3x3(x, w1_ref), g1_ref, be1_ref), 0.0)
    # conv2 -> IN2 -> +residual -> ReLU
    o = instance_norm(conv3x3(t, w2_ref), g2_ref, be2_ref)
    o = jnp.maximum(o + x, 0.0)
    out_ref[...] = o.astype(out_ref.dtype)


# ---------------------------------------------------------------------------
# Wrapper (no transposes, no pad: NCHW is viewed as (N, C, H*W) directly)
# ---------------------------------------------------------------------------
def residual_block_pallas(x_nchw, params):
    N, C, H, W = x_nchw.shape
    HW = H * W

    # Block the batch dim: largest divisor of N that is <= 8 samples/step.
    Nb = max(d for d in range(1, min(N, 8) + 1) if N % d == 0)

    x_flat = x_nchw.reshape(N, C, HW)                 # pure reshape, no transpose

    def w_to_taps(w_oihw):
        # (O, I, 3, 3) -> (O, 9*I), flat column index = (ky*3 + kx)*C + i
        return jnp.transpose(w_oihw, (0, 2, 3, 1)).reshape(C, 9 * C)

    w1 = w_to_taps(params["w1"])
    w2 = w_to_taps(params["w2"])
    g1 = params["g1"].reshape(C, 1)
    be1 = params["be1"].reshape(C, 1)
    g2 = params["g2"].reshape(C, 1)
    be2 = params["be2"].reshape(C, 1)
    # NOTE: conv biases params["b1"]/params["b2"] are NOT passed: a bias added
    # immediately before InstanceNorm is exactly removed by the per-channel
    # mean subtraction, so they are dead work in the kernel.

    kernel = functools.partial(_residual_block_kernel, W=W)

    def param_spec(shape):
        return pl.BlockSpec(shape, lambda n: (0,) * len(shape))

    out_flat = pl.pallas_call(
        kernel,
        out_shape=jax.ShapeDtypeStruct((N, C, HW), x_nchw.dtype),
        grid_spec=pltpu.PrefetchScalarGridSpec(
            num_scalar_prefetch=0,
            grid=(N // Nb,),
            in_specs=[
                pl.BlockSpec((Nb, C, HW), lambda n: (n, 0, 0)),
                param_spec((C, 9 * C)),
                param_spec((C, 1)),
                param_spec((C, 1)),
                param_spec((C, 9 * C)),
                param_spec((C, 1)),
                param_spec((C, 1)),
            ],
            out_specs=pl.BlockSpec((Nb, C, HW), lambda n: (n, 0, 0)),
        ),
        compiler_params=pltpu.CompilerParams(
            dimension_semantics=("parallel",)),   # batch axis -> both TCs on v7x
    )(x_flat, w1, g1, be1, w2, g2, be2)

    return out_flat.reshape(N, C, H, W)


# ---------------------------------------------------------------------------
# Parameter setup (synthetic, deterministic) — includes spectral normalization
# of the conv weights (power iteration, mirroring nn.utils.spectral_norm).
# ---------------------------------------------------------------------------
def spectral_normalize(w_oihw, key, n_iter=1, eps=1e-12):
    O = w_oihw.shape[0]
    mat = w_oihw.reshape(O, -1)
    u = jax.random.normal(key, (O,), dtype=w_oihw.dtype)
    u = u / (jnp.linalg.norm(u) + eps)
    v = None
    for _ in range(n_iter):
        v = mat.T @ u
        v = v / (jnp.linalg.norm(v) + eps)
        u = mat @ v
        u = u / (jnp.linalg.norm(u) + eps)
    sigma = u @ (mat @ v)
    return w_oihw / sigma


def make_params(channels, key):
    ks = jax.random.split(key, 10)
    C = channels
    w1_raw = 0.3 * jax.random.normal(ks[0], (C, C, 3, 3), jnp.float32)
    w2_raw = 0.3 * jax.random.normal(ks[1], (C, C, 3, 3), jnp.float32)
    params = {
        "w1": spectral_normalize(w1_raw, ks[2]),
        "b1": 0.1 * jax.random.normal(ks[3], (C,), jnp.float32),
        "w2": spectral_normalize(w2_raw, ks[4]),
        "b2": 0.1 * jax.random.normal(ks[5], (C,), jnp.float32),
        "g1": 1.0 + 0.1 * jax.random.normal(ks[6], (C,), jnp.float32),
        "be1": 0.1 * jax.random.normal(ks[7], (C,), jnp.float32),
        "g2": 1.0 + 0.1 * jax.random.normal(ks[8], (C,), jnp.float32),
        "be2": 0.1 * jax.random.normal(ks[9], (C,), jnp.float32),
    }
    return params


# ---------------------------------------------------------------------------
# Pure-JAX reference (for correctness check against the Pallas kernel)
# ---------------------------------------------------------------------------
def ref_residual_block(x_nchw, params):
    def conv(x, w, b):
        xp = jnp.pad(x, ((0, 0), (0, 0), (1, 1), (1, 1)), mode="reflect")
        y = jax.lax.conv_general_dilated(
            xp, w, window_strides=(1, 1), padding="VALID",
            dimension_numbers=("NCHW", "OIHW", "NCHW"))
        return y + b[None, :, None, None]

    def inorm(x, g, be):
        m = jnp.mean(x, axis=(2, 3), keepdims=True)
        v = jnp.mean((x - m) ** 2, axis=(2, 3), keepdims=True)
        return (x - m) * jax.lax.rsqrt(v + 1e-5) * g[None, :, None, None] + be[None, :, None, None]

    out = jax.nn.relu(inorm(conv(x_nchw, params["w1"], params["b1"]),
                            params["g1"], params["be1"]))
    out = inorm(conv(out, params["w2"], params["b2"]), params["g2"], params["be2"])
    return jax.nn.relu(out + x_nchw)


if __name__ == "__main__":
    key = jax.random.PRNGKey(0)
    k_x, k_p = jax.random.split(key)

    N, C, H, W = 2, 4, 16, 16                 # small shapes consistent with the module
    x = jax.random.normal(k_x, (N, C, H, W), jnp.float32)
    params = make_params(C, k_p)

    out = residual_block_pallas(x, params)
    out = jax.block_until_ready(out)

    ref = jax.block_until_ready(ref_residual_block(x, params))
    assert out.shape == (N, C, H, W)
    assert jnp.allclose(out, ref, atol=1e-3, rtol=1e-3), \
        f"max abs err {jnp.max(jnp.abs(out - ref))}"

    print("KERNEL_OK")
</pallas_src>

<mosaic_0001>
module attributes {stable_mosaic.version = 11 : i64} {
  func.func @_residual_block_kernel(%arg0: i32, %arg1: memref<2x4x256xf32, #tpu.memory_space<vmem>>, %arg2: memref<4x36xf32, #tpu.memory_space<vmem>>, %arg3: memref<4x1xf32, #tpu.memory_space<vmem>>, %arg4: memref<4x1xf32, #tpu.memory_space<vmem>>, %arg5: memref<4x36xf32, #tpu.memory_space<vmem>>, %arg6: memref<4x1xf32, #tpu.memory_space<vmem>>, %arg7: memref<4x1xf32, #tpu.memory_space<vmem>>, %arg8: memref<2x4x256xf32, #tpu.memory_space<vmem>>) attributes {dimension_semantics = [#tpu.dimension_semantics<parallel>], iteration_bounds = array<i64: 1>, scalar_prefetch = 0 : i64, scratch_operands = 0 : i64, tpu.core_type = #tpu.core_type<tc>, window_params = [{transform_indices = @transform_0, window_bounds = array<i64: 2, 4, 256>}, {pipeline_mode = #tpu.pipeline_mode<synchronous>, transform_indices = @transform_1, window_bounds = array<i64: 4, 36>}, {pipeline_mode = #tpu.pipeline_mode<synchronous>, transform_indices = @transform_2, window_bounds = array<i64: 4, 1>}, {pipeline_mode = #tpu.pipeline_mode<synchronous>, transform_indices = @transform_3, window_bounds = array<i64: 4, 1>}, {pipeline_mode = #tpu.pipeline_mode<synchronous>, transform_indices = @transform_4, window_bounds = array<i64: 4, 36>}, {pipeline_mode = #tpu.pipeline_mode<synchronous>, transform_indices = @transform_5, window_bounds = array<i64: 4, 1>}, {pipeline_mode = #tpu.pipeline_mode<synchronous>, transform_indices = @transform_6, window_bounds = array<i64: 4, 1>}, {transform_indices = @transform_7, window_bounds = array<i64: 2, 4, 256>}]} {
    %c0 = arith.constant 0 : index
    %c0_0 = arith.constant 0 : index
    %c0_1 = arith.constant 0 : index
    %0 = vector.load %arg1[%c0, %c0_0, %c0_1] : memref<2x4x256xf32, #tpu.memory_space<vmem>>, vector<2x4x256xf32>
    %1 = tpu.iota {dimensions = array<i32: 2>} : vector<2x4x256xi32>
    %c16_i32 = arith.constant 16 : i32
    %c0_i32 = arith.constant 0 : i32
    %2 = arith.cmpi eq, %c16_i32, %c0_i32 : i32
    %c1_i32 = arith.constant 1 : i32
    %3 = arith.select %2, %c1_i32, %c16_i32 : i32
    %4 = vector.broadcast %3 : i32 to vector<2x4x256xi32>
    %5 = arith.remsi %1, %4 : vector<2x4x256xi32>
    %c0_i32_2 = arith.constant 0 : i32
    %6 = vector.broadcast %c0_i32_2 : i32 to vector<2x4x256xi32>
    %7 = arith.cmpi ne, %5, %6 : vector<2x4x256xi32>
    %c0_i32_3 = arith.constant 0 : i32
    %8 = vector.broadcast %c0_i32_3 : i32 to vector<2x4x256xi32>
    %9 = arith.cmpi slt, %5, %8 : vector<2x4x256xi32>
    %c0_i32_4 = arith.constant 0 : i32
    %10 = arith.cmpi slt, %3, %c0_i32_4 : i32
    %11 = vector.broadcast %10 : i1 to vector<2x4x256xi1>
    %12 = vector.broadcast %11 : vector<2x4x256xi1> to vector<2x4x256xi1>
    %13 = arith.xori %9, %12 : vector<2x4x256xi1>
    %14 = arith.andi %13, %7 : vector<2x4x256xi1>
    %15 = vector.broadcast %3 : i32 to vector<2x4x256xi32>
    %16 = arith.addi %5, %15 : vector<2x4x256xi32>
    %17 = arith.select %14, %16, %5 : vector<2x4x256xi1>, vector<2x4x256xi32>
    %c0_i32_5 = arith.constant 0 : i32
    %18 = vector.broadcast %c0_i32_5 : i32 to vector<2x4x256xi32>
    %19 = arith.cmpi eq, %17, %18 : vector<2x4x256xi32>
    %c15_i32 = arith.constant 15 : i32
    %20 = vector.broadcast %c15_i32 : i32 to vector<2x4x256xi32>
    %21 = arith.cmpi eq, %17, %20 : vector<2x4x256xi32>
    %c16_i32_6 = arith.constant 16 : i32
    %22 = vector.broadcast %c16_i32_6 : i32 to vector<2x4x256xi32>
    %23 = arith.cmpi slt, %1, %22 : vector<2x4x256xi32>
    %c240_i32 = arith.constant 240 : i32
    %24 = vector.broadcast %c240_i32 : i32 to vector<2x4x256xi32>
    %25 = arith.cmpi sge, %1, %24 : vector<2x4x256xi32>
    %26 = vector.extract_strided_slice %0 {offsets = [0, 0, 16], sizes = [2, 4, 240], strides = [1, 1, 1]} : vector<2x4x256xf32> to vector<2x4x240xf32>
    %27 = vector.extract_strided_slice %0 {offsets = [0, 0, 0], sizes = [2, 4, 16], strides = [1, 1, 1]} : vector<2x4x256xf32> to vector<2x4x16xf32>
    %28 = tpu.concatenate %26, %27 in 2 : vector<2x4x240xf32>, vector<2x4x16xf32> -> vector<2x4x256xf32>
    %29 = vector.extract_strided_slice %0 {offsets = [0, 0, 240], sizes = [2, 4, 16], strides = [1, 1, 1]} : vector<2x4x256xf32> to vector<2x4x16xf32>
    %30 = vector.extract_strided_slice %0 {offsets = [0, 0, 0], sizes = [2, 4, 240], strides = [1, 1, 1]} : vector<2x4x256xf32> to vector<2x4x240xf32>
    %31 = tpu.concatenate %29, %30 in 2 : vector<2x4x16xf32>, vector<2x4x240xf32> -> vector<2x4x256xf32>
    %32 = arith.select %23, %28, %31 : vector<2x4x256xi1>, vector<2x4x256xf32>
    %33 = arith.select %25, %31, %28 : vector<2x4x256xi1>, vector<2x4x256xf32>
    %34 = vector.extract_strided_slice %32 {offsets = [0, 0, 1], sizes = [2, 4, 255], strides = [1, 1, 1]} : vector<2x4x256xf32> to vector<2x4x255xf32>
    %35 = vector.extract_strided_slice %32 {offsets = [0, 0, 0], sizes = [2, 4, 1], strides = [1, 1, 1]} : vector<2x4x256xf32> to vector<2x4x1xf32>
    %36 = tpu.concatenate %34, %35 in 2 : vector<2x4x255xf32>, vector<2x4x1xf32> -> vector<2x4x256xf32>
    %37 = vector.extract_strided_slice %32 {offsets = [0, 0, 255], sizes = [2, 4, 1], strides = [1, 1, 1]} : vector<2x4x256xf32> to vector<2x4x1xf32>
    %38 = vector.extract_strided_slice %32 {offsets = [0, 0, 0], sizes = [2, 4, 255], strides = [1, 1, 1]} : vector<2x4x256xf32> to vector<2x4x255xf32>
    %39 = tpu.concatenate %37, %38 in 2 : vector<2x4x1xf32>, vector<2x4x255xf32> -> vector<2x4x256xf32>
    %40 = arith.select %19, %36, %39 : vector<2x4x256xi1>, vector<2x4x256xf32>
    %41 = arith.select %21, %39, %36 : vector<2x4x256xi1>, vector<2x4x256xf32>
    %42 = vector.extract_strided_slice %0 {offsets = [0, 0, 1], sizes = [2, 4, 255], strides = [1, 1, 1]} : vector<2x4x256xf32> to vector<2x4x255xf32>
    %43 = vector.extract_strided_slice %0 {offsets = [0, 0, 0], sizes = [2, 4, 1], strides = [1, 1, 1]} : vector<2x4x256xf32> to vector<2x4x1xf32>
    %44 = tpu.concatenate %42, %43 in 2 : vector<2x4x255xf32>, vector<2x4x1xf32> -> vector<2x4x256xf32>
    %45 = vector.extract_strided_slice %0 {offsets = [0, 0, 255], sizes = [2, 4, 1], strides = [1, 1, 1]} : vector<2x4x256xf32> to vector<2x4x1xf32>
    %46 = vector.extract_strided_slice %0 {offsets = [0, 0, 0], sizes = [2, 4, 255], strides = [1, 1, 1]} : vector<2x4x256xf32> to vector<2x4x255xf32>
    %47 = tpu.concatenate %45, %46 in 2 : vector<2x4x1xf32>, vector<2x4x255xf32> -> vector<2x4x256xf32>
    %48 = arith.select %19, %44, %47 : vector<2x4x256xi1>, vector<2x4x256xf32>
    %49 = arith.select %21, %47, %44 : vector<2x4x256xi1>, vector<2x4x256xf32>
    %50 = vector.extract_strided_slice %33 {offsets = [0, 0, 1], sizes = [2, 4, 255], strides = [1, 1, 1]} : vector<2x4x256xf32> to vector<2x4x255xf32>
    %51 = vector.extract_strided_slice %33 {offsets = [0, 0, 0], sizes = [2, 4, 1], strides = [1, 1, 1]} : vector<2x4x256xf32> to vector<2x4x1xf32>
    %52 = tpu.concatenate %50, %51 in 2 : vector<2x4x255xf32>, vector<2x4x1xf32> -> vector<2x4x256xf32>
    %53 = vector.extract_strided_slice %33 {offsets = [0, 0, 255], sizes = [2, 4, 1], strides = [1, 1, 1]} : vector<2x4x256xf32> to vector<2x4x1xf32>
    %54 = vector.extract_strided_slice %33 {offsets = [0, 0, 0], sizes = [2, 4, 255], strides = [1, 1, 1]} : vector<2x4x256xf32> to vector<2x4x255xf32>
    %55 = tpu.concatenate %53, %54 in 2 : vector<2x4x1xf32>, vector<2x4x255xf32> -> vector<2x4x256xf32>
    %56 = arith.select %19, %52, %55 : vector<2x4x256xi1>, vector<2x4x256xf32>
    %57 = arith.select %21, %55, %52 : vector<2x4x256xi1>, vector<2x4x256xf32>
    %58 = tpu.concatenate %40, %32, %41, %48, %0, %49, %56, %33, %57 in 1 : vector<2x4x256xf32>, vector<2x4x256xf32>, vector<2x4x256xf32>, vector<2x4x256xf32>, vector<2x4x256xf32>, vector<2x4x256xf32>, vector<2x4x256xf32>, vector<2x4x256xf32>, vector<2x4x256xf32> -> vector<2x36x256xf32>
    %c0_7 = arith.constant 0 : index
    %c0_8 = arith.constant 0 : index
    %59 = vector.load %arg2[%c0_7, %c0_8] : memref<4x36xf32, #tpu.memory_space<vmem>>, vector<4x36xf32>
    %60 = vector.shape_cast %59 : vector<4x36xf32> to vector<1x4x36xf32>
    %61 = vector.broadcast %60 : vector<1x4x36xf32> to vector<2x4x36xf32>
    %cst = arith.constant dense<0.000000e+00> : vector<2x4x256xf32>
    %62 = tpu.matmul %61, %58, %cst {dimension_numbers = #tpu.dot_dimension_numbers<[2], [1], [1], [2], [0, 0, 0, 1, 1, 2], [0], [0]>} : vector<2x4x36xf32>, vector<2x36x256xf32>, vector<2x4x256xf32> -> vector<2x4x256xf32>
    %cst_9 = arith.constant dense<0.000000e+00> : vector<2x4xf32>
    %63 = vector.multi_reduction <add>, %62, %cst_9 [2] : vector<2x4x256xf32> to vector<2x4xf32>
    %64 = vector.shape_cast %63 : vector<2x4xf32> to vector<2x4x1xf32>
    %cst_10 = arith.constant 2.560000e+02 : f32
    %65 = vector.broadcast %cst_10 : f32 to vector<2x4x1xf32>
    %66 = arith.divf %64, %65 : vector<2x4x1xf32>
    %67 = vector.broadcast %66 : vector<2x4x1xf32> to vector<2x4x256xf32>
    %68 = arith.subf %62, %67 : vector<2x4x256xf32>
    %69 = arith.mulf %68, %68 : vector<2x4x256xf32>
    %cst_11 = arith.constant dense<0.000000e+00> : vector<2x4xf32>
    %70 = vector.multi_reduction <add>, %69, %cst_11 [2] : vector<2x4x256xf32> to vector<2x4xf32>
    %71 = vector.shape_cast %70 : vector<2x4xf32> to vector<2x4x1xf32>
    %cst_12 = arith.constant 2.560000e+02 : f32
    %72 = vector.broadcast %cst_12 : f32 to vector<2x4x1xf32>
    %73 = arith.divf %71, %72 : vector<2x4x1xf32>
    %c0_13 = arith.constant 0 : index
    %c0_14 = arith.constant 0 : index
    %74 = vector.load %arg3[%c0_13, %c0_14] : memref<4x1xf32, #tpu.memory_space<vmem>>, vector<4x1xf32>
    %cst_15 = arith.constant 9.99999974E-6 : f32
    %75 = vector.broadcast %cst_15 : f32 to vector<2x4x1xf32>
    %76 = arith.addf %73, %75 : vector<2x4x1xf32>
    %77 = math.rsqrt %76 : vector<2x4x1xf32>
    %78 = vector.shape_cast %74 : vector<4x1xf32> to vector<1x4x1xf32>
    %79 = vector.broadcast %78 : vector<1x4x1xf32> to vector<2x4x1xf32>
    %80 = arith.mulf %79, %77 : vector<2x4x1xf32>
    %c0_16 = arith.constant 0 : index
    %c0_17 = arith.constant 0 : index
    %81 = vector.load %arg4[%c0_16, %c0_17] : memref<4x1xf32, #tpu.memory_space<vmem>>, vector<4x1xf32>
    %82 = arith.mulf %66, %80 : vector<2x4x1xf32>
    %83 = vector.shape_cast %81 : vector<4x1xf32> to vector<1x4x1xf32>
    %84 = vector.broadcast %83 : vector<1x4x1xf32> to vector<2x4x1xf32>
    %85 = arith.subf %84, %82 : vector<2x4x1xf32>
    %86 = vector.broadcast %80 : vector<2x4x1xf32> to vector<2x4x256xf32>
    %87 = arith.mulf %62, %86 : vector<2x4x256xf32>
    %88 = vector.broadcast %85 : vector<2x4x1xf32> to vector<2x4x256xf32>
    %89 = arith.addf %87, %88 : vector<2x4x256xf32>
    %cst_18 = arith.constant 0.000000e+00 : f32
    %90 = vector.broadcast %cst_18 : f32 to vector<2x4x256xf32>
    %91 = arith.maximumf %89, %90 : vector<2x4x256xf32>
    %92 = vector.extract_strided_slice %91 {offsets = [0, 0, 16], sizes = [2, 4, 240], strides = [1, 1, 1]} : vector<2x4x256xf32> to vector<2x4x240xf32>
    %93 = vector.extract_strided_slice %91 {offsets = [0, 0, 0], sizes = [2, 4, 16], strides = [1, 1, 1]} : vector<2x4x256xf32> to vector<2x4x16xf32>
    %94 = tpu.concatenate %92, %93 in 2 : vector<2x4x240xf32>, vector<2x4x16xf32> -> vector<2x4x256xf32>
    %95 = vector.extract_strided_slice %91 {offsets = [0, 0, 240], sizes = [2, 4, 16], strides = [1, 1, 1]} : vector<2x4x256xf32> to vector<2x4x16xf32>
    %96 = vector.extract_strided_slice %91 {offsets = [0, 0, 0], sizes = [2, 4, 240], strides = [1, 1, 1]} : vector<2x4x256xf32> to vector<2x4x240xf32>
    %97 = tpu.concatenate %95, %96 in 2 : vector<2x4x16xf32>, vector<2x4x240xf32> -> vector<2x4x256xf32>
    %98 = arith.select %23, %94, %97 : vector<2x4x256xi1>, vector<2x4x256xf32>
    %99 = arith.select %25, %97, %94 : vector<2x4x256xi1>, vector<2x4x256xf32>
    %100 = vector.extract_strided_slice %98 {offsets = [0, 0, 1], sizes = [2, 4, 255], strides = [1, 1, 1]} : vector<2x4x256xf32> to vector<2x4x255xf32>
    %101 = vector.extract_strided_slice %98 {offsets = [0, 0, 0], sizes = [2, 4, 1], strides = [1, 1, 1]} : vector<2x4x256xf32> to vector<2x4x1xf32>
    %102 = tpu.concatenate %100, %101 in 2 : vector<2x4x255xf32>, vector<2x4x1xf32> -> vector<2x4x256xf32>
    %103 = vector.extract_strided_slice %98 {offsets = [0, 0, 255], sizes = [2, 4, 1], strides = [1, 1, 1]} : vector<2x4x256xf32> to vector<2x4x1xf32>
    %104 = vector.extract_strided_slice %98 {offsets = [0, 0, 0], sizes = [2, 4, 255], strides = [1, 1, 1]} : vector<2x4x256xf32> to vector<2x4x255xf32>
    %105 = tpu.concatenate %103, %104 in 2 : vector<2x4x1xf32>, vector<2x4x255xf32> -> vector<2x4x256xf32>
    %106 = arith.select %19, %102, %105 : vector<2x4x256xi1>, vector<2x4x256xf32>
    %107 = arith.select %21, %105, %102 : vector<2x4x256xi1>, vector<2x4x256xf32>
    %108 = vector.extract_strided_slice %91 {offsets = [0, 0, 1], sizes = [2, 4, 255], strides = [1, 1, 1]} : vector<2x4x256xf32> to vector<2x4x255xf32>
    %109 = vector.extract_strided_slice %91 {offsets = [0, 0, 0], sizes = [2, 4, 1], strides = [1, 1, 1]} : vector<2x4x256xf32> to vector<2x4x1xf32>
    %110 = tpu.concatenate %108, %109 in 2 : vector<2x4x255xf32>, vector<2x4x1xf32> -> vector<2x4x256xf32>
    %111 = vector.extract_strided_slice %91 {offsets = [0, 0, 255], sizes = [2, 4, 1], strides = [1, 1, 1]} : vector<2x4x256xf32> to vector<2x4x1xf32>
    %112 = vector.extract_strided_slice %91 {offsets = [0, 0, 0], sizes = [2, 4, 255], strides = [1, 1, 1]} : vector<2x4x256xf32> to vector<2x4x255xf32>
    %113 = tpu.concatenate %111, %112 in 2 : vector<2x4x1xf32>, vector<2x4x255xf32> -> vector<2x4x256xf32>
    %114 = arith.select %19, %110, %113 : vector<2x4x256xi1>, vector<2x4x256xf32>
    %115 = arith.select %21, %113, %110 : vector<2x4x256xi1>, vector<2x4x256xf32>
    %116 = vector.extract_strided_slice %99 {offsets = [0, 0, 1], sizes = [2, 4, 255], strides = [1, 1, 1]} : vector<2x4x256xf32> to vector<2x4x255xf32>
    %117 = vector.extract_strided_slice %99 {offsets = [0, 0, 0], sizes = [2, 4, 1], strides = [1, 1, 1]} : vector<2x4x256xf32> to vector<2x4x1xf32>
    %118 = tpu.concatenate %116, %117 in 2 : vector<2x4x255xf32>, vector<2x4x1xf32> -> vector<2x4x256xf32>
    %119 = vector.extract_strided_slice %99 {offsets = [0, 0, 255], sizes = [2, 4, 1], strides = [1, 1, 1]} : vector<2x4x256xf32> to vector<2x4x1xf32>
    %120 = vector.extract_strided_slice %99 {offsets = [0, 0, 0], sizes = [2, 4, 255], strides = [1, 1, 1]} : vector<2x4x256xf32> to vector<2x4x255xf32>
    %121 = tpu.concatenate %119, %120 in 2 : vector<2x4x1xf32>, vector<2x4x255xf32> -> vector<2x4x256xf32>
    %122 = arith.select %19, %118, %121 : vector<2x4x256xi1>, vector<2x4x256xf32>
    %123 = arith.select %21, %121, %118 : vector<2x4x256xi1>, vector<2x4x256xf32>
    %124 = tpu.concatenate %106, %98, %107, %114, %91, %115, %122, %99, %123 in 1 : vector<2x4x256xf32>, vector<2x4x256xf32>, vector<2x4x256xf32>, vector<2x4x256xf32>, vector<2x4x256xf32>, vector<2x4x256xf32>, vector<2x4x256xf32>, vector<2x4x256xf32>, vector<2x4x256xf32> -> vector<2x36x256xf32>
    %c0_19 = arith.constant 0 : index
    %c0_20 = arith.constant 0 : index
    %125 = vector.load %arg5[%c0_19, %c0_20] : memref<4x36xf32, #tpu.memory_space<vmem>>, vector<4x36xf32>
    %126 = vector.shape_cast %125 : vector<4x36xf32> to vector<1x4x36xf32>
    %127 = vector.broadcast %126 : vector<1x4x36xf32> to vector<2x4x36xf32>
    %cst_21 = arith.constant dense<0.000000e+00> : vector<2x4x256xf32>
    %128 = tpu.matmul %127, %124, %cst_21 {dimension_numbers = #tpu.dot_dimension_numbers<[2], [1], [1], [2], [0, 0, 0, 1, 1, 2], [0], [0]>} : vector<2x4x36xf32>, vector<2x36x256xf32>, vector<2x4x256xf32> -> vector<2x4x256xf32>
    %cst_22 = arith.constant dense<0.000000e+00> : vector<2x4xf32>
    %129 = vector.multi_reduction <add>, %128, %cst_22 [2] : vector<2x4x256xf32> to vector<2x4xf32>
    %130 = vector.shape_cast %129 : vector<2x4xf32> to vector<2x4x1xf32>
    %cst_23 = arith.constant 2.560000e+02 : f32
    %131 = vector.broadcast %cst_23 : f32 to vector<2x4x1xf32>
    %132 = arith.divf %130, %131 : vector<2x4x1xf32>
    %133 = vector.broadcast %132 : vector<2x4x1xf32> to vector<2x4x256xf32>
    %134 = arith.subf %128, %133 : vector<2x4x256xf32>
    %135 = arith.mulf %134, %134 : vector<2x4x256xf32>
    %cst_24 = arith.constant dense<0.000000e+00> : vector<2x4xf32>
    %136 = vector.multi_reduction <add>, %135, %cst_24 [2] : vector<2x4x256xf32> to vector<2x4xf32>
    %137 = vector.shape_cast %136 : vector<2x4xf32> to vector<2x4x1xf32>
    %cst_25 = arith.constant 2.560000e+02 : f32
    %138 = vector.broadcast %cst_25 : f32 to vector<2x4x1xf32>
    %139 = arith.divf %137, %138 : vector<2x4x1xf32>
    %c0_26 = arith.constant 0 : index
    %c0_27 = arith.constant 0 : index
    %140 = vector.load %arg6[%c0_26, %c0_27] : memref<4x1xf32, #tpu.memory_space<vmem>>, vector<4x1xf32>
    %cst_28 = arith.constant 9.99999974E-6 : f32
    %141 = vector.broadcast %cst_28 : f32 to vector<2x4x1xf32>
    %142 = arith.addf %139, %141 : vector<2x4x1xf32>
    %143 = math.rsqrt %142 : vector<2x4x1xf32>
    %144 = vector.shape_cast %140 : vector<4x1xf32> to vector<1x4x1xf32>
    %145 = vector.broadcast %144 : vector<1x4x1xf32> to vector<2x4x1xf32>
    %146 = arith.mulf %145, %143 : vector<2x4x1xf32>
    %c0_29 = arith.constant 0 : index
    %c0_30 = arith.constant 0 : index
    %147 = vector.load %arg7[%c0_29, %c0_30] : memref<4x1xf32, #tpu.memory_space<vmem>>, vector<4x1xf32>
    %148 = arith.mulf %132, %146 : vector<2x4x1xf32>
    %149 = vector.shape_cast %147 : vector<4x1xf32> to vector<1x4x1xf32>
    %150 = vector.broadcast %149 : vector<1x4x1xf32> to vector<2x4x1xf32>
    %151 = arith.subf %150, %148 : vector<2x4x1xf32>
    %152 = vector.broadcast %146 : vector<2x4x1xf32> to vector<2x4x256xf32>
    %153 = arith.mulf %128, %152 : vector<2x4x256xf32>
    %154 = vector.broadcast %151 : vector<2x4x1xf32> to vector<2x4x256xf32>
    %155 = arith.addf %153, %154 : vector<2x4x256xf32>
    %156 = arith.addf %155, %0 : vector<2x4x256xf32>
    %cst_31 = arith.constant 0.000000e+00 : f32
    %157 = vector.broadcast %cst_31 : f32 to vector<2x4x256xf32>
    %158 = arith.maximumf %156, %157 : vector<2x4x256xf32>
    %c0_32 = arith.constant 0 : index
    %c0_33 = arith.constant 0 : index
    %c0_34 = arith.constant 0 : index
    %159 = vector.load %arg8[%c0_32, %c0_33, %c0_34] : memref<2x4x256xf32, #tpu.memory_space<vmem>>, vector<2x4x256xf32>
    tpu.vector_store %arg8[%c0_32, %c0_33, %c0_34], %158 {strides = array<i32>} : memref<2x4x256xf32, #tpu.memory_space<vmem>>, vector<2x4x256xf32>,
    return
  }
  func.func @transform_0(%arg0: i32) -> (i32, i32, i32) {
    %c0_i32 = arith.constant 0 : i32
    %c0_i32_0 = arith.constant 0 : i32
    %c0_i32_1 = arith.constant 0 : i32
    return %arg0, %c0_i32, %c0_i32_0 : i32, i32, i32
  }
  func.func @transform_1(%arg0: i32) -> (i32, i32) {
    %c0_i32 = arith.constant 0 : i32
    %c0_i32_0 = arith.constant 0 : i32
    %c0_i32_1 = arith.constant 0 : i32
    return %c0_i32, %c0_i32_0 : i32, i32
  }
  func.func @transform_2(%arg0: i32) -> (i32, i32) {
    %c0_i32 = arith.constant 0 : i32
    %c0_i32_0 = arith.constant 0 : i32
    %c0_i32_1 = arith.constant 0 : i32
    return %c0_i32, %c0_i32_0 : i32, i32
  }
  func.func @transform_3(%arg0: i32) -> (i32, i32) {
    %c0_i32 = arith.constant 0 : i32
    %c0_i32_0 = arith.constant 0 : i32
    %c0_i32_1 = arith.constant 0 : i32
    return %c0_i32, %c0_i32_0 : i32, i32
  }
  func.func @transform_4(%arg0: i32) -> (i32, i32) {
    %c0_i32 = arith.constant 0 : i32
    %c0_i32_0 = arith.constant 0 : i32
    %c0_i32_1 = arith.constant 0 : i32
    return %c0_i32, %c0_i32_0 : i32, i32
  }
  func.func @transform_5(%arg0: i32) -> (i32, i32) {
    %c0_i32 = arith.constant 0 : i32
    %c0_i32_0 = arith.constant 0 : i32
    %c0_i32_1 = arith.constant 0 : i32
    return %c0_i32, %c0_i32_0 : i32, i32
  }
  func.func @transform_6(%arg0: i32) -> (i32, i32) {
    %c0_i32 = arith.constant 0 : i32
    %c0_i32_0 = arith.constant 0 : i32
    %c0_i32_1 = arith.constant 0 : i32
    return %c0_i32, %c0_i32_0 : i32, i32
  }
  func.func @transform_7(%arg0: i32) -> (i32, i32, i32) {
    %c0_i32 = arith.constant 0 : i32
    %c0_i32_0 = arith.constant 0 : i32
    %c0_i32_1 = arith.constant 0 : i32
    return %arg0, %c0_i32, %c0_i32_0 : i32, i32, i32
  }
}

</mosaic_0001>

<bundles_post_ra>
// kernel: tpu_custom_call.1
= control target key start
LH: loop header
LB: loop body
LE: loop exit
PB: predicated region body
PF: predicated region fallthrough
CT: control target
= control target key end

     0   :  { %s1230_s28 = smov 112   ;;  %s1841_s0 = inlined_call_operand.vmem [shape: f32[2,4,256], index: 0, kind: input, shape index: {}]   ;;  %s1842_s1 = inlined_call_operand.vmem [shape: f32[4,36], index: 1, kind: input, shape index: {}]   ;;  %s1843_s2 = inlined_call_operand.vmem [shape: f32[4,1], index: 2, kind: input, shape index: {}]   ;;  %s1844_s3 = inlined_call_operand.vmem [shape: f32[4,1], index: 3, kind: input, shape index: {}]   ;;  %s1845_s4 = inlined_call_operand.vmem [shape: f32[4,36], index: 4, kind: input, shape index: {}]   ;;  %s1846_s5 = inlined_call_operand.vmem [shape: f32[4,1], index: 5, kind: input, shape index: {}]   ;;  %s1847_s6 = inlined_call_operand.vmem [shape: f32[4,1], index: 6, kind: input, shape index: {}]   ;;  %s1848_s7 = inlined_call_operand.hbm [shape: f32[2,4,256], index: 7, kind: output, shape index: {}]  }
   0x1   :  { %v1282_v0 = vld [vmem:[%s1841_s0 + $0x8] sm:$0xff]  ;;  %v1287_v1 = vld [vmem:[%s1841_s0] sm:$0xff] }
   0x2   :  { %72 = vrot.lane.b32.xlu1 %v1282_v0, %s1230_s28  ;;  %68 = vrot.lane.b32.xlu0 %v1287_v1, %s1230_s28  ;;  %v1295_v2 = vcombine.high %v1282_v0, %v1282_v0  ;;  %v1299_v3 = vcombine.high %v1287_v1, %v1287_v1 }
   0x3   :  { %12 = vsyncpa [#allocation3], 0  ;;  %s1231_s29 = smov 16   ;;  %s1232_s30 = smov 127   ;;  %v1127_v6 = vpack.i.bf16 %v1282_v0, %v1287_v1  ;;  %v29_v12 = vlaneseq  ;;  %vm76_vm0 = vcmask 916480   ;;  %vm97_vm1 = vcmask 130048  }
   0x4   :  { %v1117_v4 = vpack.i.bf16 %v1295_v2, %v1282_v0  ;;  %v1112_v5 = vpack.i.bf16 %v1299_v3, %v1287_v1  ;;  %v1122_v7 = vpack.i.bf16 %v1295_v2, %v1299_v3  ;;  %s1233_s8 = smov 1   ;;  %v1234_v35 = vmov 0.0   ;;  %s1236_s19 = smov [#allocation2]  }
   0x5   :  { %v1325_v15 = vand.u32 127, %v29_v12  ;;  %390 = vmatprep.mubr.f32.mxu0 %v1234_v35  ;;  %467 = vmatprep.mubr.f32.mxu1 %v1234_v35  ;;  %vm126_vm4 = vcmask 1039360   ;;  %vm147_vm5 = vcmask 7168   ;;  %vm298_vm10 = vcmask 1043456   ;;  %s1048_s20 = sshll.u32 %s1236_s19, 4  ;;  %s1049_s20 = int_to_ptr.vmem [resolvable:$true] %s1048_s20 }
   0x6   :  { %74 = vrot.lane.b32.xlu1 %v1295_v2, %s1230_s28  ;;  %70 = vrot.lane.b32.xlu0 %v1299_v3, %s1230_s28  ;;  %vm316_vm11 = vcmask 293888   ;;  %s1206_s21 = scalar_lea.vmem %s1049_s20, 256  ;;  %p1211_p1 = scmp.lt.s32.totalorder %s1049_s20, %s1049_s20 }
   0x7   :  { %vm60_vm2 = vcmp.lt.s32.totalorder %v1325_v15, 16  ;;  %v1359_v28 = vadd.s32 128, %v1325_v15  ;;  %v36_v44 = vand.u32 15, %v1325_v15  ;;  %p1207_p0 = scmp.ne.s32.totalorder %s1049_s20, %s1206_s21  ;;  %p1212_p2 = scmp.lt.s32.totalorder %s1206_s21, %s1206_s21 }
   0x9   :  { %vm63_vm3 = vcmp.ge.s32.totalorder %v1359_v28, 240  ;;  %v43_v45 = vand.u32 15, %v1359_v28  ;;  %vm1414_vm6 = vcmp.eq.s32.totalorder %v36_v44, 0  ;;  %vm1418_vm7 = vcmp.eq.s32.totalorder %v36_v44, 15  ;;  %p1213_p3 = por %p1212_p2, %p1211_p1 }
   0xa   :  { %89 = vrot.lane.b32.xlu1 %v1295_v2, %s1231_s29  ;;  %87 = vrot.lane.b32.xlu0 %v1299_v3, %s1231_s29 }
   0xb   :  { %vm1422_vm8 = vcmp.eq.s32.totalorder %v43_v45, 0  ;;  %vm1426_vm9 = vcmp.eq.s32.totalorder %v43_v45, 15  ;;  %p1214_p4 = pnand %p1213_p3, %p1207_p0 }
   0xe   :  { %95 = vrot.lane.b32.xlu1 %v1282_v0, %s1231_s29  ;;  %93 = vrot.lane.b32.xlu0 %v1287_v1, %s1231_s29 }
  0x12   :  { %1118 = vrot.lane.b32.xlu1 %v1117_v4, %s1232_s30  ;;  %1113 = vrot.lane.b32.xlu0 %v1112_v5, %s1232_s30 }
  0x16   :  { %1128 = vrot.lane.b32.xlu1 %v1127_v6, %s1233_s8  ;;  %1123 = vrot.lane.b32.xlu0 %v1122_v7, %s1233_s8 }
  0x74   :  { %v73_v8 = vpop.permute.xlu1 %72  ;;  %v69_v9 = vpop.permute.xlu0 %68 }
  0x78   :  { %v75_v10 = vpop.permute.xlu1 %74  ;;  %v71_v11 = vpop.permute.xlu0 %70 }
  0x79   :  { %v1329_v16 = vsel %vm76_vm0, %v73_v8, %v75_v10  ;;  %v1347_v25 = vsel %vm76_vm0, %v69_v9, %v71_v11  ;;  %v85_v30 = vsel %vm76_vm0, %v71_v11, %v69_v9  ;;  %v86_v33 = vsel %vm76_vm0, %v75_v10, %v73_v8 }
  0x7c   :  { %v90_v13 = vpop.permute.xlu1 %89  ;;  %v88_v14 = vpop.permute.xlu0 %87 }
  0x80   :  { %v96_v17 = vpop.permute.xlu1 %95  ;;  %v94_v18 = vpop.permute.xlu0 %93 }
  0x81   :  { %v1332_v19 = vsel %vm97_vm1, %v96_v17, %v90_v13  ;;  %v105_v20 = vsel %vm97_vm1, %v90_v13, %v96_v17  ;;  %v1336_v21 = vsel %vm97_vm1, %v94_v18, %v88_v14  ;;  %v104_v22 = vsel %vm97_vm1, %v88_v14, %v94_v18 }
  0x82   :  { %v1342_v23 = vsel %vm60_vm2, %v1329_v16, %v105_v20  ;;  %v1132_v24 = vpack.i.bf16 %v1332_v19, %v1336_v21  ;;  %v1354_v27 = vsel %vm60_vm2, %v1347_v25, %v104_v22  ;;  %v1373_v31 = vsel %vm63_vm3, %v1336_v21, %v85_v30 }
  0x83   :  { %v1142_v26 = vpack.i.bf16 %v1332_v19, %v1342_v23  ;;  %v1147_v29 = vpack.i.bf16 %v1342_v23, %v1354_v27  ;;  %v1137_v32 = vpack.i.bf16 %v1336_v21, %v1354_v27  ;;  %v1384_v34 = vsel %vm63_vm3, %v1332_v19, %v86_v33 }
  0x84   :  { %1133 = vrot.lane.b32.xlu0 %v1132_v24, %s1233_s8  ;;  %v1119_v36 = vpop.permute.xlu1 %1118  ;;  %v1114_v37 = vpop.permute.xlu0 %1113  ;;  %v258_v10 = vrot.slane %v1342_v23, 4  ;;  %v259_v13 = vrot.slane %v1332_v19, 4  ;;  %v256_v45 = vrot.slane %v1354_v27, 4 }
  0x85   :  { %1143 = vrot.lane.b32.xlu1 %v1142_v26, %s1232_s30  ;;  %v1121_v40 = vunpack.i.h.bf16 %v1119_v36  ;;  %v1120_v41 = vunpack.i.l.bf16 %v1119_v36  ;;  %v1116_v46 = vunpack.i.h.bf16 %v1114_v37  ;;  %v1115_v47 = vunpack.i.l.bf16 %v1114_v37 }
  0x87   :  { %v1403_v51 = vsel %vm126_vm4, %v1120_v41, %v1121_v40  ;;  %v1406_v52 = vsel %vm126_vm4, %v1121_v40, %v1120_v41  ;;  %v172_v60 = vsel %vm126_vm4, %v1115_v47, %v1116_v46  ;;  %v180_v61 = vsel %vm126_vm4, %v1116_v46, %v1115_v47 }
  0x88   :  { %212 = vrot.lane.b32.xlu0 %v1347_v25, %s1232_s30  ;;  %v1129_v38 = vpop.permute.xlu1 %1128  ;;  %v1124_v39 = vpop.permute.xlu0 %1123 }
  0x89   :  { %1148 = vrot.lane.b32.xlu1 %v1147_v29, %s1233_s8  ;;  %v1131_v42 = vunpack.i.h.bf16 %v1129_v38  ;;  %v1126_v43 = vunpack.i.h.bf16 %v1124_v39  ;;  %v1130_v48 = vunpack.i.l.bf16 %v1129_v38  ;;  %v1125_v49 = vunpack.i.l.bf16 %v1124_v39 }
  0x8b   :  { %v1409_v53 = vsel %vm147_vm5, %v1131_v42, %v1126_v43  ;;  %v1412_v54 = vsel %vm147_vm5, %v1126_v43, %v1131_v42  ;;  %v192_v62 = vsel %vm147_vm5, %v1130_v48, %v1125_v49  ;;  %v198_v63 = vsel %vm147_vm5, %v1125_v49, %v1130_v48 }
  0x8c   :  { %216 = vrot.lane.b32.xlu0 %v1329_v16, %s1232_s30  ;;  %v203_v7 = vsel %vm1422_vm8, %v1406_v52, %v1409_v53  ;;  %v202_v8 = vsel %vm1414_vm6, %v1403_v51, %v1412_v54  ;;  %v204_v14 = vsel %vm1418_vm7, %v198_v63, %v172_v60  ;;  %v205_v17 = vsel %vm1426_vm9, %v192_v62, %v180_v61 }
  0x8d   :  { %214 = vrot.lane.b32.xlu1 %v1373_v31, %s1232_s30  ;;  %v271_v18 = vrot.slane %v203_v7, 4  ;;  %v270_v20 = vrot.slane %v202_v8, 4  ;;  %v201_v39 = vsel %vm1422_vm8, %v180_v61, %v192_v62  ;;  %v200_v40 = vsel %vm1414_vm6, %v172_v60, %v198_v63 }
  0x8e   :  { %v206_v46 = vsel %vm1418_vm7, %v1412_v54, %v1403_v51  ;;  %v257_v49 = vrot.slane %v1336_v21, 4  ;;  %v282_v27 = vrot.slane %v204_v14, 4  ;;  %v268_v51 = vrot.slane %v200_v40, 4 }
  0x90   :  { %1138 = vrot.lane.b32.xlu0 %v1137_v32, %s1232_s30 }
  0x91   :  { %218 = vrot.lane.b32.xlu1 %v1384_v34, %s1232_s30 }
  0x94   :  { %230 = vrot.lane.b32.xlu0 %v1373_v31, %s1233_s8 }
  0x95   :  { %232 = vrot.lane.b32.xlu1 %v1384_v34, %s1233_s8 }
  0x98   :  { %236 = vrot.lane.b32.xlu0 %v1347_v25, %s1233_s8 }
  0x99   :  { %238 = vrot.lane.b32.xlu1 %v1329_v16, %s1233_s8 }
  0xf6   :  { %v1400_v50 = vpop.permute.xlu0 %1133 }
  0xf7   :  { %v1144_v55 = vpop.permute.xlu1 %1143  ;;  %v1136_v11 = vunpack.i.h.bf16 %v1400_v50  ;;  %v1135_v60 = vunpack.i.l.bf16 %v1400_v50 }
  0xf8   :  { %v1146_v4 = vunpack.i.h.bf16 %v1144_v55  ;;  %v1145_v5 = vunpack.i.l.bf16 %v1144_v55  ;;  %v207_v55 = vsel %vm1426_vm9, %v1409_v53, %v1406_v52 }
  0xfa   :  { %v1434_v6 = vpop.permute.xlu0 %212  ;;  %v128_v22 = vsel %vm126_vm4, %v1145_v5, %v1146_v4  ;;  %v136_v23 = vsel %vm126_vm4, %v1146_v4, %v1145_v5  ;;  %v283_v4 = vrot.slane %v205_v17, 4  ;;  %v269_v5 = vrot.slane %v201_v39, 4 }
  0xfb   :  { %v1149_v9 = vpop.permute.xlu1 %1148 }
  0xfc   :  { %v1151_v12 = vunpack.i.h.bf16 %v1149_v9  ;;  %v1150_v41 = vunpack.i.l.bf16 %v1149_v9 }
  0xfe   :  { %v155_v24 = vsel %vm147_vm5, %v1136_v11, %v1151_v12  ;;  %v217_v26 = vpop.permute.xlu0 %216  ;;  %v149_v29 = vsel %vm147_vm5, %v1151_v12, %v1136_v11  ;;  %v154_v54 = vsel %vm147_vm5, %v1135_v60, %v1150_v41  ;;  %v148_v8 = vsel %vm147_vm5, %v1150_v41, %v1135_v60 }
  0xff   :  { %v215_v30 = vpop.permute.xlu1 %214  ;;  %v159_v19 = vsel %vm1422_vm8, %v136_v23, %v149_v29  ;;  %v163_v32 = vsel %vm1426_vm9, %v149_v29, %v136_v23  ;;  %v158_v33 = vsel %vm1414_vm6, %v128_v22, %v155_v24  ;;  %v162_v36 = vsel %vm1418_vm7, %v155_v24, %v128_v22 }
 0x100   :  { %v302_v37 = vsel %vm298_vm10, %v159_v19, %v259_v13  ;;  %v306_v38 = vsel %vm298_vm10, %v163_v32, %v271_v18  ;;  %v301_v43 = vsel %vm298_vm10, %v158_v33, %v258_v10  ;;  %v305_v44 = vsel %vm298_vm10, %v162_v36, %v270_v20 }
 0x101   :  { %v1079_v42 = vpack.c.bf16 %v306_v38, %v302_v37  ;;  %v1081_v48 = vpack.c.bf16 %v305_v44, %v301_v43  ;;  %v292_v18 = vrot.slane %v1329_v16, 4  ;;  %v290_v20 = vrot.slane %v1347_v25, 4 }
 0x102   :  { %v1139_v47 = vpop.permute.xlu0 %1138  ;;  %v291_v23 = vrot.slane %v1373_v31, 4  ;;  %v293_v29 = vrot.slane %v1384_v34, 4  ;;  %v284_v19 = vrot.slane %v206_v46, 4  ;;  %v285_v32 = vrot.slane %v207_v55, 4 }
 0x103   :  { %v1141_v61 = vunpack.i.h.bf16 %v1139_v47  ;;  %v1140_v62 = vunpack.i.l.bf16 %v1139_v47  ;;  %v219_v63 = vpop.permute.xlu1 %218  ;;  %1080 = vmatprep.subr.bf16.mxu1 %v1079_v42  ;;  %v220_v33 = vsel %vm126_vm4, %v1434_v6, %v215_v30  ;;  %v228_v36 = vsel %vm126_vm4, %v215_v30, %v1434_v6 }
 0x104   :  { %1082 = vmatpush1.bf16.msra.mxu1 %v1081_v48  ;;  %v308_v16 = vsel %vm298_vm10, %v1299_v3, %v283_v4  ;;  %v307_v25 = vsel %vm298_vm10, %v1287_v1, %v282_v27  ;;  %v221_v31 = vsel %vm126_vm4, %v217_v26, %v219_v63  ;;  %v229_v34 = vsel %vm126_vm4, %v219_v63, %v217_v26 }
 0x105   :  { %v127_v21 = vsel %vm126_vm4, %v1140_v62, %v1141_v61  ;;  %v135_v7 = vsel %vm126_vm4, %v1141_v61, %v1140_v62  ;;  %v310_v47 = vsel %vm298_vm10, %v1295_v2, %v285_v32  ;;  %v309_v55 = vsel %vm298_vm10, %v1282_v0, %v284_v19  ;;  %v315_v0 = vld [vmem:[%s1842_s1] sm:$0xf] }
 0x106   :  { %v231_v52 = vpop.permute.xlu0 %230  ;;  %v157_v50 = vsel %vm1422_vm8, %v135_v7, %v148_v8  ;;  %v161_v53 = vsel %vm1426_vm9, %v148_v8, %v135_v7  ;;  %v156_v9 = vsel %vm1414_vm6, %v127_v21, %v154_v54  ;;  %v160_v10 = vsel %vm1418_vm7, %v154_v54, %v127_v21 }
 0x107   :  { %v233_v11 = vpop.permute.xlu1 %232  ;;  %v300_v12 = vsel %vm298_vm10, %v157_v50, %v257_v49  ;;  %v304_v13 = vsel %vm298_vm10, %v161_v53, %v269_v5  ;;  %v299_v14 = vsel %vm298_vm10, %v156_v9, %v256_v45  ;;  %v303_v17 = vsel %vm298_vm10, %v160_v10, %v268_v51 }
 0x108   :  { %v1071_v22 = vpack.c.bf16 %v304_v13, %v300_v12  ;;  %v1073_v24 = vpack.c.bf16 %v303_v17, %v299_v14 }
 0x10a   :  { %v237_v37 = vpop.permute.xlu0 %236  ;;  %1072 = vmatprep.subr.bf16.mxu0 %v1071_v22 }
 0x10b   :  { %v240_v38 = vsel %vm147_vm5, %v237_v37, %v231_v52  ;;  %v246_v39 = vsel %vm147_vm5, %v231_v52, %v237_v37  ;;  %v239_v40 = vpop.permute.xlu1 %238  ;;  %1074 = vmatpush1.bf16.msra.mxu0 %v1073_v24 }
 0x10c   :  { %v248_v6 = vsel %vm1414_vm6, %v220_v33, %v246_v39  ;;  %v249_v30 = vsel %vm1422_vm8, %v228_v36, %v240_v38  ;;  %v241_v41 = vsel %vm147_vm5, %v239_v40, %v233_v11  ;;  %v247_v1 = vsel %vm147_vm5, %v233_v11, %v239_v40 }
 0x10d   :  { %v250_v42 = vsel %vm1414_vm6, %v221_v31, %v247_v1  ;;  %v251_v26 = vsel %vm1422_vm8, %v229_v34, %v241_v41  ;;  %v312_v43 = vsel %vm298_vm10, %v249_v30, %v291_v23  ;;  %v311_v44 = vsel %vm298_vm10, %v248_v6, %v290_v20  ;;  %v507_v6 = vld [vmem:[%s1843_s2] sm:$0xf] }
 0x10e   :  { %v1075_v45 = vpack.c.bf16 %v312_v43, %v308_v16  ;;  %v1077_v46 = vpack.c.bf16 %v311_v44, %v307_v25  ;;  %v314_v48 = vsel %vm298_vm10, %v251_v26, %v293_v29  ;;  %v313_v60 = vsel %vm298_vm10, %v250_v42, %v292_v18 }
 0x10f   :  { %v1083_v49 = vpack.c.bf16 %v314_v48, %v310_v47  ;;  %v1085_v61 = vpack.c.bf16 %v313_v60, %v309_v55  ;;  %v253_v62 = vsel %vm1426_vm9, %v240_v38, %v228_v36  ;;  %v255_v63 = vsel %vm1426_vm9, %v241_v41, %v229_v34 }
 0x110   :  { %1076 = vmatprep.subr.bf16.mxu0 %v1075_v45  ;;  %v252_v27 = vsel %vm1418_vm7, %v246_v39, %v220_v33  ;;  %v254_v4 = vsel %vm1418_vm7, %v247_v1, %v221_v31  ;;  %v1235_v16 = vmov 0   ;;  %v514_v1 = vld [vmem:[%s1844_s3] sm:$0xf] }
 0x111   :  { %1078 = vmatpush1.bf16.msra.mxu0 %v1077_v46  ;;  %1084 = vmatprep.subr.bf16.mxu1 %v1083_v49 }
 0x112   :  { %1059 = vmatprep.subr.msk.mxu0 %vm298_vm10, %v253_v62  ;;  %1086 = vmatpush1.bf16.msra.mxu1 %v1085_v61 }
 0x113   :  { %1062 = vmatprep.subr.msk.mxu1 %vm298_vm10, %v255_v63  ;;  %1152 = vset.pattern.permute.xlu1 %v1235_v16 }
 0x114   :  { %1153 = vset.pattern.permute.xlu0 %v1235_v16 }
 0x115   :  { %1060 = vmatpush1.msk.msra.mxu0 %vm298_vm10, %v252_v27 }
 0x116   :  { %1061 = vmatmul.mubr.msk.f32.vlgmr.msra.gmra.mrb[0].mxu0 %vm316_vm11, %v315_v0  ;;  %1063 = vmatpush1.msk.msra.mxu1 %vm298_vm10, %v254_v4 }
 0x117   :  { %1064 = vmatmul.mubr.msk.f32.vlgmr.msra.gmra.mrb[0].mxu1 %vm316_vm11, %v315_v0  ;;  %869 = vmatprep.mubr.f32.mxu0 %v1234_v35 }
 0x118   :  { %946 = vmatprep.mubr.f32.mxu1 %v1234_v35 }
 0x1e9   :  { %v392_v5 = vpop.f32.mrb[0].mxu0 }
 0x1ea   :  { %v394_v51 = vpop.f32.mrb[1].mxu0  ;;  %v1551_v54 = vpop.f32.mrb[0].mxu1  ;;  %v474_v21 = vsel %vm298_vm10, %v392_v5, 0.0 }
 0x1eb   :  { %v471_v7 = vpop.f32.mrb[1].mxu1  ;;  %v475_v8 = vsel %vm298_vm10, %v394_v51, 0.0  ;;  %v479_v52 = vsel %vm298_vm10, %v1551_v54, 0.0 }
 0x1ec   :  { %v476_v50 = vadd.f32 %v475_v8, %v474_v21  ;;  %v480_v53 = vsel %vm298_vm10, %v471_v7, 0.0 }
 0x1ed   :  { %v481_v9 = vadd.f32 %v480_v53, %v479_v52 }
 0x1ee   :  { %477 = vadd.xlane.f32.xlu0 %v476_v50 }
 0x1ef   :  { %482 = vadd.xlane.f32.xlu1 %v481_v9 }
 0x27b   :  { %v478_v10 = vpop.xlane.xlu0 %477 }
 0x27c   :  { %v485_v35 = vmul.f32 0.00390625, %v478_v10  ;;  %v483_v11 = vpop.xlane.xlu1 %482 }
 0x27d   :  { %v486_v12 = vmul.f32 0.00390625, %v483_v11 }
 0x27e   :  { %v487_v13 = vsub.f32 %v392_v5, %v485_v35  ;;  %v488_v14 = vsub.f32 %v394_v51, %v485_v35 }
 0x27f   :  { %v489_v17 = vsub.f32 %v1551_v54, %v486_v12  ;;  %v490_v18 = vsub.f32 %v471_v7, %v486_v12 }
 0x280   :  { %v491_v20 = vmul.f32 %v487_v13, %v487_v13  ;;  %v492_v22 = vmul.f32 %v488_v14, %v488_v14 }
 0x281   :  { %v493_v24 = vmul.f32 %v489_v17, %v489_v17  ;;  %v494_v23 = vmul.f32 %v490_v18, %v490_v18 }
 0x282   :  { %v495_v29 = vsel %vm298_vm10, %v491_v20, 0.0  ;;  %v496_v19 = vsel %vm298_vm10, %v492_v22, 0.0 }
 0x283   :  { %v497_v32 = vadd.f32 %v496_v19, %v495_v29  ;;  %v500_v33 = vsel %vm298_vm10, %v493_v24, 0.0  ;;  %v501_v36 = vsel %vm298_vm10, %v494_v23, 0.0 }
 0x284   :  { %v502_v37 = vadd.f32 %v501_v36, %v500_v33 }
 0x285   :  { %498 = vadd.xlane.f32.xlu0 %v497_v32 }
 0x289   :  { %503 = vadd.xlane.f32.xlu0 %v502_v37 }
 0x312   :  { %v499_v25 = vpop.xlane.xlu0 %498 }
 0x313   :  { %v505_v31 = vmul.f32 0.00390625, %v499_v25 }
 0x315   :  { %v508_v34 = vadd.f32 1e-05, %v505_v31 }
 0x316   :  { %v504_v38 = vpop.xlane.xlu0 %503 }
 0x317   :  { %1196 = vrsqrt.f32 %v508_v34  ;;  %v506_v39 = vmul.f32 0.00390625, %v504_v38 }
 0x319   :  { %v509_v40 = vadd.f32 1e-05, %v506_v39 }
 0x31b   :  { %1198 = vrsqrt.f32 %v509_v40 }
 0x321   :  { %v1197_v30 = vpop.eup %1196 }
 0x322   :  { %v512_v41 = vmul.f32 %v1197_v30, %v507_v6 }
 0x324   :  { %521 = vperm.xlu1 %1152, %v512_v41   ;;  %v515_v42 = vmul.f32 %v512_v41, %v485_v35 }
 0x325   :  { %v1199_v26 = vpop.eup %1198 }
 0x326   :  { %v517_v43 = vsub.f32 %v514_v1, %v515_v42  ;;  %v513_v44 = vmul.f32 %v1199_v26, %v507_v6 }
 0x328   :  { %535 = vperm.xlu1 %1152, %v517_v43   ;;  %526 = vperm.xlu0 %1153, %v513_v44   ;;  %v516_v45 = vmul.f32 %v513_v44, %v486_v12 }
 0x32a   :  { %v518_v46 = vsub.f32 %v514_v1, %v516_v45 }
 0x32c   :  { %540 = vperm.xlu1 %1152, %v518_v46  }
 0x3a3   :  { %v522_v47 = vpop.permute.xlu1 %521 }
 0x3a4   :  { %v529_v48 = vmul.f32 %v522_v47, %v392_v5  ;;  %v530_v49 = vmul.f32 %v522_v47, %v394_v51 }
 0x3a7   :  { %v536_v55 = vpop.permute.xlu1 %535  ;;  %v527_v60 = vpop.permute.xlu0 %526 }
 0x3a8   :  { %v543_v61 = vadd.f32 %v536_v55, %v529_v48  ;;  %v544_v62 = vadd.f32 %v536_v55, %v530_v49  ;;  %v532_v27 = vmul.f32 %v527_v60, %v471_v7  ;;  %v531_v21 = vmul.f32 %v527_v60, %v1551_v54 }
 0x3aa   :  { %v1569_v63 = vmax.f32 %v543_v61, 0.0  ;;  %v1571_v0 = vmax.f32 %v544_v62, 0.0 }
 0x3ab   :  { %v541_v4 = vpop.permute.xlu1 %540 }
 0x3ac   :  { %v546_v8 = vadd.f32 %v541_v4, %v532_v27  ;;  %579 = vrot.lane.b32.xlu0 %v1569_v63, %s1231_s29  ;;  %555 = vrot.lane.b32.xlu1 %v1569_v63, %s1230_s28  ;;  %v545_v5 = vadd.f32 %v541_v4, %v531_v21  ;;  %v1154_v52 = vpack.i.bf16 %v1571_v0, %v1569_v63 }
 0x3ae   :  { %v1578_v51 = vmax.f32 %v546_v8, 0.0  ;;  %v1585_v7 = vmax.f32 %v545_v5, 0.0 }
 0x3b0   :  { %1155 = vrot.lane.b32.xlu0 %v1154_v52, %s1232_s30  ;;  %557 = vrot.lane.b32.xlu1 %v1571_v0, %s1230_s28  ;;  %v1164_v54 = vpack.i.bf16 %v1578_v51, %v1571_v0  ;;  %v1159_v50 = vpack.i.bf16 %v1578_v51, %v1585_v7  ;;  %v1169_v53 = vpack.i.bf16 %v1585_v7, %v1569_v63 }
 0x3b4   :  { %1165 = vrot.lane.b32.xlu0 %v1164_v54, %s1233_s8  ;;  %559 = vrot.lane.b32.xlu1 %v1585_v7, %s1230_s28 }
 0x3b8   :  { %561 = vrot.lane.b32.xlu1 %v1578_v51, %s1230_s28 }
 0x3bc   :  { %573 = vrot.lane.b32.xlu1 %v1571_v0, %s1231_s29 }
 0x3c0   :  { %575 = vrot.lane.b32.xlu1 %v1578_v51, %s1231_s29 }
 0x3c4   :  { %581 = vrot.lane.b32.xlu1 %v1585_v7, %s1231_s29 }
 0x3c8   :  { %1160 = vrot.lane.b32.xlu1 %v1159_v50, %s1232_s30 }
 0x3cc   :  { %1170 = vrot.lane.b32.xlu1 %v1169_v53, %s1233_s8 }
 0x41e   :  { %v556_v9 = vpop.permute.xlu1 %555  ;;  %v580_v14 = vpop.permute.xlu0 %579 }
 0x422   :  { %v558_v10 = vpop.permute.xlu1 %557  ;;  %v1156_v39 = vpop.permute.xlu0 %1155 }
 0x423   :  { %v1628_v33 = vsel %vm76_vm0, %v556_v9, %v558_v10  ;;  %v571_v16 = vsel %vm76_vm0, %v558_v10, %v556_v9  ;;  %v1158_v26 = vunpack.i.h.bf16 %v1156_v39  ;;  %v1157_v44 = vunpack.i.l.bf16 %v1156_v39 }
 0x425   :  { %v655_v5 = vsel %vm126_vm4, %v1157_v44, %v1158_v26  ;;  %v663_v52 = vsel %vm126_vm4, %v1158_v26, %v1157_v44 }
 0x426   :  { %v560_v35 = vpop.permute.xlu1 %559  ;;  %v1166_v40 = vpop.permute.xlu0 %1165 }
 0x427   :  { %v1168_v30 = vunpack.i.h.bf16 %v1166_v40  ;;  %v1167_v45 = vunpack.i.l.bf16 %v1166_v40 }
 0x42a   :  { %v562_v11 = vpop.permute.xlu1 %561 }
 0x42b   :  { %v1607_v18 = vsel %vm76_vm0, %v560_v35, %v562_v11  ;;  %v572_v31 = vsel %vm76_vm0, %v562_v11, %v560_v35 }
 0x42e   :  { %v574_v12 = vpop.permute.xlu1 %573 }
 0x42f   :  { %v1610_v20 = vsel %vm97_vm1, %v580_v14, %v574_v12  ;;  %v589_v19 = vsel %vm97_vm1, %v574_v12, %v580_v14 }
 0x430   :  { %v1634_v36 = vsel %vm60_vm2, %v1628_v33, %v589_v19  ;;  %v1647_v25 = vsel %vm63_vm3, %v1610_v20, %v571_v16 }
 0x431   :  { %v1179_v15 = vpack.i.bf16 %v1610_v20, %v1634_v36 }
 0x432   :  { %v576_v13 = vpop.permute.xlu1 %575 }
 0x436   :  { %v582_v17 = vpop.permute.xlu1 %581 }
 0x437   :  { %v1613_v22 = vsel %vm97_vm1, %v582_v17, %v576_v13  ;;  %v590_v24 = vsel %vm97_vm1, %v576_v13, %v582_v17 }
 0x438   :  { %v1619_v23 = vsel %vm60_vm2, %v1607_v18, %v590_v24  ;;  %v1174_v29 = vpack.i.bf16 %v1613_v22, %v1610_v20  ;;  %v1658_v34 = vsel %vm63_vm3, %v1613_v22, %v572_v31  ;;  %v742_v53 = vrot.slane %v1613_v22, 4 }
 0x439   :  { %v1184_v32 = vpack.i.bf16 %v1613_v22, %v1619_v23  ;;  %v1189_v37 = vpack.i.bf16 %v1619_v23, %v1634_v36  ;;  %v741_v50 = vrot.slane %v1619_v23, 4 }
 0x43a   :  { %1175 = vrot.lane.b32.xlu0 %v1174_v29, %s1233_s8  ;;  %v1161_v38 = vpop.permute.xlu1 %1160 }
 0x43b   :  { %1185 = vrot.lane.b32.xlu1 %v1184_v32, %s1232_s30  ;;  %v1163_v41 = vunpack.i.h.bf16 %v1161_v38  ;;  %v1162_v1 = vunpack.i.l.bf16 %v1161_v38 }
 0x43d   :  { %v1679_v49 = vsel %vm126_vm4, %v1162_v1, %v1163_v41  ;;  %v1682_v55 = vsel %vm126_vm4, %v1163_v41, %v1162_v1  ;;  %v739_v41 = vrot.slane %v1634_v36, 4  ;;  %v740_v1 = vrot.slane %v1610_v20, 4 }
 0x43e   :  { %695 = vrot.lane.b32.xlu0 %v1628_v33, %s1232_s30  ;;  %v1171_v28 = vpop.permute.xlu1 %1170 }
 0x43f   :  { %1190 = vrot.lane.b32.xlu1 %v1189_v37, %s1233_s8  ;;  %v1173_v6 = vunpack.i.h.bf16 %v1171_v28  ;;  %v1172_v42 = vunpack.i.l.bf16 %v1171_v28 }
 0x441   :  { %v1673_v46 = vsel %vm147_vm5, %v1173_v6, %v1168_v30  ;;  %v1676_v47 = vsel %vm147_vm5, %v1168_v30, %v1173_v6  ;;  %v675_v60 = vsel %vm147_vm5, %v1172_v42, %v1167_v45  ;;  %v681_v61 = vsel %vm147_vm5, %v1167_v45, %v1172_v42 }
 0x442   :  { %699 = vrot.lane.b32.xlu0 %v1607_v18, %s1232_s30  ;;  %v685_v62 = vsel %vm1414_vm6, %v1679_v49, %v1676_v47  ;;  %v686_v27 = vsel %vm1422_vm8, %v1682_v55, %v1673_v46  ;;  %v683_v35 = vsel %vm1414_vm6, %v655_v5, %v681_v61  ;;  %v684_v11 = vsel %vm1422_vm8, %v663_v52, %v675_v60 }
 0x443   :  { %697 = vrot.lane.b32.xlu1 %v1647_v25, %s1232_s30  ;;  %v753_v12 = vrot.slane %v685_v62, 4  ;;  %v754_v13 = vrot.slane %v686_v27, 4  ;;  %v688_v31 = vsel %vm1426_vm9, %v675_v60, %v663_v52  ;;  %v689_v42 = vsel %vm1418_vm7, %v1676_v47, %v1679_v49 }
 0x444   :  { %v690_v45 = vsel %vm1426_vm9, %v1673_v46, %v1682_v55  ;;  %v751_v36 = vrot.slane %v683_v35, 4  ;;  %v752_v20 = vrot.slane %v684_v11, 4  ;;  %v771_v11 = vrot.slane %v1628_v33, 4 }
 0x446   :  { %1180 = vrot.lane.b32.xlu0 %v1179_v15, %s1232_s30  ;;  %v687_v15 = vsel %vm1418_vm7, %v681_v61, %v655_v5 }
 0x447   :  { %701 = vrot.lane.b32.xlu1 %v1658_v34, %s1232_s30  ;;  %v763_v27 = vrot.slane %v687_v15, 4 }
 0x44a   :  { %713 = vrot.lane.b32.xlu0 %v1647_v25, %s1233_s8 }
 0x44b   :  { %715 = vrot.lane.b32.xlu1 %v1658_v34, %s1233_s8 }
 0x44e   :  { %719 = vrot.lane.b32.xlu0 %v1628_v33, %s1233_s8 }
 0x44f   :  { %721 = vrot.lane.b32.xlu1 %v1607_v18, %s1233_s8 }
 0x4ac   :  { %v1670_v43 = vpop.permute.xlu0 %1175 }
 0x4ad   :  { %v1186_v48 = vpop.permute.xlu1 %1185  ;;  %v1178_v9 = vunpack.i.h.bf16 %v1670_v43 }
 0x4ae   :  { %v1188_v4 = vunpack.i.h.bf16 %v1186_v48  ;;  %v1187_v21 = vunpack.i.l.bf16 %v1186_v48  ;;  %v1177_v48 = vunpack.i.l.bf16 %v1670_v43 }
 0x4b0   :  { %v1694_v8 = vpop.permute.xlu0 %695  ;;  %v612_v14 = vsel %vm126_vm4, %v1187_v21, %v1188_v4  ;;  %v620_v17 = vsel %vm126_vm4, %v1188_v4, %v1187_v21  ;;  %v764_v4 = vrot.slane %v688_v31, 4 }
 0x4b1   :  { %v1191_v54 = vpop.permute.xlu1 %1190 }
 0x4b2   :  { %v1193_v10 = vunpack.i.h.bf16 %v1191_v54  ;;  %v1192_v28 = vunpack.i.l.bf16 %v1191_v54  ;;  %v788_v33 = vsel %vm298_vm10, %v1571_v0, %v764_v4 }
 0x4b4   :  { %v632_v24 = vsel %vm147_vm5, %v1193_v10, %v1178_v9  ;;  %v638_v23 = vsel %vm147_vm5, %v1178_v9, %v1193_v10  ;;  %v1709_v22 = vpop.permute.xlu0 %699  ;;  %v631_v47 = vsel %vm147_vm5, %v1192_v28, %v1177_v48  ;;  %v637_v49 = vsel %vm147_vm5, %v1177_v48, %v1192_v28 }
 0x4b5   :  { %v641_v29 = vsel %vm1414_vm6, %v612_v14, %v638_v23  ;;  %v645_v19 = vsel %vm1418_vm7, %v638_v23, %v612_v14  ;;  %v698_v32 = vpop.permute.xlu1 %697  ;;  %v642_v37 = vsel %vm1422_vm8, %v620_v17, %v632_v24  ;;  %v646_v16 = vsel %vm1426_vm9, %v632_v24, %v620_v17 }
 0x4b6   :  { %v782_v38 = vsel %vm298_vm10, %v642_v37, %v742_v53  ;;  %v786_v39 = vsel %vm298_vm10, %v646_v16, %v754_v13  ;;  %v781_v6 = vsel %vm298_vm10, %v641_v29, %v741_v50  ;;  %v785_v30 = vsel %vm298_vm10, %v645_v19, %v753_v12 }
 0x4b7   :  { %v1095_v40 = vpack.c.bf16 %v786_v39, %v782_v38  ;;  %v1097_v44 = vpack.c.bf16 %v785_v30, %v781_v6  ;;  %v773_v14 = vrot.slane %v1607_v18, 4  ;;  %v765_v17 = vrot.slane %v689_v42, 4 }
 0x4b8   :  { %v1181_v26 = vpop.permute.xlu0 %1180  ;;  %v772_v24 = vrot.slane %v1647_v25, 4  ;;  %v774_v23 = vrot.slane %v1658_v34, 4  ;;  %v766_v29 = vrot.slane %v690_v45, 4  ;;  %v703_v19 = vsel %vm126_vm4, %v1694_v8, %v698_v32 }
 0x4b9   :  { %v1183_v60 = vunpack.i.h.bf16 %v1181_v26  ;;  %v1182_v61 = vunpack.i.l.bf16 %v1181_v26  ;;  %v702_v62 = vpop.permute.xlu1 %701  ;;  %1096 = vmatprep.subr.bf16.mxu1 %v1095_v40  ;;  %v787_v16 = vsel %vm298_vm10, %v1569_v63, %v763_v27  ;;  %v711_v18 = vsel %vm126_vm4, %v698_v32, %v1694_v8 }
 0x4ba   :  { %1098 = vmatpush1.bf16.msra.mxu1 %v1097_v44  ;;  %v704_v25 = vsel %vm126_vm4, %v1709_v22, %v702_v62  ;;  %v712_v38 = vsel %vm126_vm4, %v702_v62, %v1709_v22  ;;  %v790_v42 = vsel %vm298_vm10, %v1578_v51, %v766_v29  ;;  %v795_v51 = vld [vmem:[%s1845_s4] sm:$0xf] }
 0x4bb   :  { %v611_v21 = vsel %vm126_vm4, %v1182_v61, %v1183_v60  ;;  %v619_v5 = vsel %vm126_vm4, %v1183_v60, %v1182_v61 }
 0x4bc   :  { %v639_v43 = vsel %vm1414_vm6, %v611_v21, %v637_v49  ;;  %v643_v46 = vsel %vm1418_vm7, %v637_v49, %v611_v21  ;;  %v714_v55 = vpop.permute.xlu0 %713  ;;  %v640_v52 = vsel %vm1422_vm8, %v619_v5, %v631_v47  ;;  %v644_v54 = vsel %vm1426_vm9, %v631_v47, %v619_v5 }
 0x4bd   :  { %v716_v50 = vpop.permute.xlu1 %715  ;;  %v780_v53 = vsel %vm298_vm10, %v640_v52, %v740_v1  ;;  %v784_v9 = vsel %vm298_vm10, %v644_v54, %v752_v20  ;;  %v779_v10 = vsel %vm298_vm10, %v639_v43, %v739_v41  ;;  %v783_v35 = vsel %vm298_vm10, %v643_v46, %v751_v36 }
 0x4be   :  { %v1087_v12 = vpack.c.bf16 %v784_v9, %v780_v53  ;;  %v1089_v13 = vpack.c.bf16 %v783_v35, %v779_v10  ;;  %v789_v41 = vsel %vm298_vm10, %v1585_v7, %v765_v17 }
 0x4c0   :  { %v720_v37 = vpop.permute.xlu0 %719  ;;  %1088 = vmatprep.subr.bf16.mxu0 %v1087_v12 }
 0x4c1   :  { %v723_v34 = vsel %vm147_vm5, %v720_v37, %v714_v55  ;;  %v729_v15 = vsel %vm147_vm5, %v714_v55, %v720_v37  ;;  %v722_v31 = vpop.permute.xlu1 %721  ;;  %1090 = vmatpush1.bf16.msra.mxu0 %v1089_v13 }
 0x4c2   :  { %v731_v63 = vsel %vm1414_vm6, %v703_v19, %v729_v15  ;;  %v732_v0 = vsel %vm1422_vm8, %v711_v18, %v723_v34  ;;  %v724_v8 = vsel %vm147_vm5, %v722_v31, %v716_v50  ;;  %v730_v39 = vsel %vm147_vm5, %v716_v50, %v722_v31 }
 0x4c3   :  { %v791_v32 = vsel %vm298_vm10, %v731_v63, %v771_v11  ;;  %v734_v28 = vsel %vm1422_vm8, %v712_v38, %v724_v8  ;;  %v792_v40 = vsel %vm298_vm10, %v732_v0, %v772_v24  ;;  %v733_v22 = vsel %vm1414_vm6, %v704_v25, %v730_v39 }
 0x4c4   :  { %v1093_v6 = vpack.c.bf16 %v791_v32, %v787_v16  ;;  %v1091_v30 = vpack.c.bf16 %v792_v40, %v788_v33  ;;  %v793_v1 = vsel %vm298_vm10, %v733_v22, %v773_v14  ;;  %v794_v26 = vsel %vm298_vm10, %v734_v28, %v774_v23  ;;  %v985_v33 = vld [vmem:[%s1846_s5] sm:$0xf] }
 0x4c5   :  { %v1101_v44 = vpack.c.bf16 %v793_v1, %v789_v41  ;;  %v1099_v58 = vpack.c.bf16 %v794_v26, %v790_v42  ;;  %v736_v45 = vsel %vm1426_vm9, %v723_v34, %v711_v18  ;;  %v738_v56 = vsel %vm1426_vm9, %v724_v8, %v712_v38  ;;  %v992_v34 = vld [vmem:[%s1847_s6] sm:$0xf] }
 0x4c6   :  { %1092 = vmatprep.subr.bf16.mxu0 %v1091_v30  ;;  %v735_v7 = vsel %vm1418_vm7, %v729_v15, %v703_v19  ;;  %v737_v48 = vsel %vm1418_vm7, %v730_v39, %v704_v25  ;;  %v1204_v42 = vld [vmem:[%s1841_s0] sm:$0xff] }
 0x4c7   :  { %1094 = vmatpush1.bf16.msra.mxu0 %v1093_v6  ;;  %1100 = vmatprep.subr.bf16.mxu1 %v1099_v58 }
 0x4c8   :  { %1065 = vmatprep.subr.msk.mxu0 %vm298_vm10, %v736_v45  ;;  %1102 = vmatpush1.bf16.msra.mxu1 %v1101_v44 }
 0x4c9   :  { %1068 = vmatprep.subr.msk.mxu1 %vm298_vm10, %v738_v56 }
 0x4cb   :  { %1066 = vmatpush1.msk.msra.mxu0 %vm298_vm10, %v735_v7 }
 0x4cc   :  { %1067 = vmatmul.mubr.msk.f32.vlgmr.msra.gmra.mrb[2].mxu0 %vm316_vm11, %v795_v51  ;;  %1069 = vmatpush1.msk.msra.mxu1 %vm298_vm10, %v737_v48 }
 0x4cd   :  { %1070 = vmatmul.mubr.msk.f32.vlgmr.msra.gmra.mrb[2].mxu1 %vm316_vm11, %v795_v51 }
 0x59f   :  { %v871_v59 = vpop.f32.mrb[2].mxu0 }
 0x5a0   :  { %v873_v60 = vpop.f32.mrb[3].mxu0  ;;  %v953_v61 = vsel %vm298_vm10, %v871_v59, 0.0  ;;  %v948_v36 = vpop.f32.mrb[2].mxu1 }
 0x5a1   :  { %v954_v62 = vsel %vm298_vm10, %v873_v60, 0.0  ;;  %v950_v20 = vpop.f32.mrb[3].mxu1  ;;  %v958_v4 = vsel %vm298_vm10, %v948_v36, 0.0 }
 0x5a2   :  { %v955_v27 = vadd.f32 %v954_v62, %v953_v61  ;;  %v959_v57 = vsel %vm298_vm10, %v950_v20, 0.0 }
 0x5a3   :  { %v960_v47 = vadd.f32 %v959_v57, %v958_v4 }
 0x5a4   :  { %956 = vadd.xlane.f32.xlu0 %v955_v27 }
 0x5a5   :  { %961 = vadd.xlane.f32.xlu1 %v960_v47 }
 0x631   :  { %v957_v49 = vpop.xlane.xlu0 %956 }
 0x632   :  { %v963_v21 = vmul.f32 0.00390625, %v957_v49  ;;  %v962_v5 = vpop.xlane.xlu1 %961 }
 0x633   :  { %v964_v43 = vmul.f32 0.00390625, %v962_v5 }
 0x634   :  { %v965_v46 = vsub.f32 %v871_v59, %v963_v21  ;;  %v966_v55 = vsub.f32 %v873_v60, %v963_v21 }
 0x635   :  { %v967_v50 = vsub.f32 %v948_v36, %v964_v43  ;;  %v968_v53 = vsub.f32 %v950_v20, %v964_v43 }
 0x636   :  { %v969_v52 = vmul.f32 %v965_v46, %v965_v46  ;;  %v970_v54 = vmul.f32 %v966_v55, %v966_v55 }
 0x637   :  { %v971_v35 = vmul.f32 %v967_v50, %v967_v50  ;;  %v972_v11 = vmul.f32 %v968_v53, %v968_v53 }
 0x638   :  { %v973_v9 = vsel %vm298_vm10, %v969_v52, 0.0  ;;  %v974_v10 = vsel %vm298_vm10, %v970_v54, 0.0 }
 0x639   :  { %v975_v12 = vadd.f32 %v974_v10, %v973_v9  ;;  %v978_v13 = vsel %vm298_vm10, %v971_v35, 0.0  ;;  %v979_v14 = vsel %vm298_vm10, %v972_v11, 0.0 }
 0x63a   :  { %v980_v17 = vadd.f32 %v979_v14, %v978_v13 }
 0x63b   :  { %976 = vadd.xlane.f32.xlu0 %v975_v12 }
 0x63f   :  { %981 = vadd.xlane.f32.xlu0 %v980_v17 }
 0x6c8   :  { %v977_v24 = vpop.xlane.xlu0 %976 }
 0x6c9   :  { %v983_v23 = vmul.f32 0.00390625, %v977_v24 }
 0x6cb   :  { %v986_v29 = vadd.f32 1e-05, %v983_v23 }
 0x6cc   :  { %v982_v19 = vpop.xlane.xlu0 %981 }
 0x6cd   :  { %1200 = vrsqrt.f32 %v986_v29  ;;  %v984_v37 = vmul.f32 0.00390625, %v982_v19 }
 0x6cf   :  { %v987_v16 = vadd.f32 1e-05, %v984_v37 }
 0x6d1   :  { %1202 = vrsqrt.f32 %v987_v16 }
 0x6d7   :  { %v1201_v18 = vpop.eup %1200 }
 0x6d8   :  { %v990_v25 = vmul.f32 %v1201_v18, %v985_v33 }
 0x6da   :  { %999 = vperm.xlu1 %1152, %v990_v25   ;;  %v993_v15 = vmul.f32 %v990_v25, %v963_v21 }
 0x6db   :  { %v1203_v31 = vpop.eup %1202 }
 0x6dc   :  { %v995_v38 = vsub.f32 %v992_v34, %v993_v15  ;;  %v991_v63 = vmul.f32 %v1203_v31, %v985_v33 }
 0x6de   :  { %1013 = vperm.xlu1 %1152, %v995_v38   ;;  %1004 = vperm.xlu0 %1153, %v991_v63   ;;  %v994_v0 = vmul.f32 %v991_v63, %v964_v43 }
 0x6e0   :  { %v996_v8 = vsub.f32 %v992_v34, %v994_v0 }
 0x6e2   :  { %1018 = vperm.xlu1 %1152, %v996_v8  }
 0x759   :  { %v1000_v32 = vpop.permute.xlu1 %999 }
 0x75a   :  { %v1007_v39 = vmul.f32 %v1000_v32, %v871_v59  ;;  %v1008_v28 = vmul.f32 %v1000_v32, %v873_v60  ;;  %v1205_v59 = vld [vmem:[%s1841_s0 + $0x8] sm:$0xff] }
 0x75d   :  { %v1005_v40 = vpop.permute.xlu0 %1004  ;;  %v1014_v6 = vpop.permute.xlu1 %1013 }
 0x75e   :  { %v1021_v22 = vadd.f32 %v1014_v6, %v1007_v39  ;;  %v1022_v30 = vadd.f32 %v1014_v6, %v1008_v28  ;;  %v1009_v41 = vmul.f32 %v1005_v40, %v948_v36  ;;  %v1010_v1 = vmul.f32 %v1005_v40, %v950_v20 }
 0x760   :  { %v1025_v26 = vadd.f32 %v1204_v42, %v1021_v22  ;;  %v1026_v44 = vadd.f32 %v1022_v30, %v1299_v3 }
 0x761   :  { %v1019_v58 = vpop.permute.xlu1 %1018 }
 0x762   :  { %v1029_v45 = vmax.f32 %v1025_v26, 0.0  ;;  %v1030_v56 = vmax.f32 %v1026_v44, 0.0  ;;  %v1023_v51 = vadd.f32 %v1019_v58, %v1009_v41  ;;  %v1024_v7 = vadd.f32 %v1019_v58, %v1010_v1 }
 0x764   :  { %v1037_v48 = vcombine.low %v1029_v45, %v1030_v56  ;;  %v1027_v60 = vadd.f32 %v1205_v59, %v1023_v51  ;;  %v1028_v61 = vadd.f32 %v1024_v7, %v1295_v2 }
 0x766   :  { %1041 = vst [vmem:[#allocation2] sm:$0xff] %v1037_v48  ;;  %v1031_v62 = vmax.f32 %v1027_v60, 0.0  ;;  %v1032_v36 = vmax.f32 %v1028_v61, 0.0 }
 0x768   :  { %v1038_v20 = vcombine.low %v1031_v62, %v1032_v36 }
 0x76a   :  { %1042 = vst [vmem:[#allocation2 + $0x8] sm:$0xff] %v1038_v20 }
 0x76b   :  { %1217 = shalt.err (!%p1214_p4)
}
 0x76c   :  { %s1218_s23 = scalar_lea.hbm %s1848_s7, 256 }
 0x76d   :  { %p1219_p5 = scmp.ne.s32.totalorder %s1848_s7, %s1218_s23  ;;  %p1222_p6 = scmp.lt.u32.totalorder %s1218_s23, %s1848_s7 }
 0x76f   :  { %p1224_p7 = pnand %p1222_p6, %p1219_p5 }
 0x771   :  { %1227 = shalt.err (!%p1224_p7)
}
 0x772   :  { %s1237_s28 = smov 128   ;;  %s1238_s29 = smov 8  }
 0x773   :  { %1054 = dma.vmem_to_hbm [thread:$0]  %s1049_s20, 256, %s1848_s7, [#allocation3], %s1237_s28, %s1237_s28, %s1238_s29  }
 0x774   :  { %1228 = dma.done.wait [#allocation3], 256  }
 0x775   :  { %1229 = vsyncadd [#allocation3], 4294967040 }
 0x776   :  { %1058 = vsyncpa [#allocation3], 1 }

</bundles_post_ra>
